<compile_context>
chip_gen: v5e
topology: v5e:2x2
jax: 0.10.0
libtpu: 0.0.40
codegen_flags: <defaults>
</compile_context>

<pallas_src>
import math
import jax
import jax.numpy as jnp
from jax.experimental import pallas as pl
from jax.experimental.pallas import tpu as pltpu

LN_EPS = 1e-12
_INV_SQRT2 = 0.7071067811865476


def _round_up(a, b):
    return (a + b - 1) // b * b


# ------------------ MLM head kernel: dense -> gelu -> LN -> decoder ----------

def _mlm_head_kernel(x_ref, wd_ref, bd_ref, g_ref, b_ref, wv_ref, bv_ref,
                     o_ref, h_scr):
    # grid = (token tiles, vocab tiles); vocab is the inner ("arbitrary") axis,
    # so the hidden transform runs once per token tile (vocab index 0), is
    # cached in VMEM scratch, and reused for every decoder-weight tile.
    @pl.when(pl.program_id(1) == 0)
    def _():
        # dense: x @ Wd + bd  (bf16 operands, f32 accumulation on the MXU)
        h = jnp.dot(x_ref[...], wd_ref[...],
                    preferred_element_type=jnp.float32) + bd_ref[...]
        # exact (erf) GELU — matches torch.nn.functional.gelu default
        h = 0.5 * h * (1.0 + jax.lax.erf(h * _INV_SQRT2))
        # LayerNorm over the hidden axis (f32)
        mu = jnp.mean(h, axis=-1, keepdims=True)
        var = jnp.mean((h - mu) * (h - mu), axis=-1, keepdims=True)
        h = (h - mu) * jax.lax.rsqrt(var + LN_EPS)
        h = h * g_ref[...] + b_ref[...]
        h_scr[...] = h.astype(h_scr.dtype)

    # decoder tile: h @ Wv[:, j*tv:(j+1)*tv] + bv tile
    o_ref[...] = (jnp.dot(h_scr[...], wv_ref[...],
                          preferred_element_type=jnp.float32)
                  + bv_ref[...]).astype(o_ref.dtype)


def bert_mlm_head(x, dense_w, dense_b, ln_gamma, ln_beta, dec_w, dec_b, *,
                  tm=256, tv=2048,
                  compute_dtype=jnp.bfloat16, out_dtype=jnp.bfloat16):
    """x: (B, S, H). Weights use the torch (out, in) convention:
    dense_w: (H, H), dec_w: (V, H); biases/LN params are 1-D."""
    B, S, H = x.shape
    V = dec_w.shape[0]
    N = B * S

    # Tile sizing: big MXU/HBM-friendly tiles, clamped and zero-padded for
    # small / ragged shapes (bf16 needs token tiles % 16, vocab tiles % 128).
    SUB, LANE = 16, 128
    tm_eff = max(SUB, min(tm, _round_up(N, SUB)) // SUB * SUB)
    N_pad = _round_up(N, tm_eff)
    tv_eff = max(LANE, min(tv, _round_up(V, LANE)) // LANE * LANE)
    V_pad = _round_up(V, tv_eff)

    # Wrapper-side layout plumbing: flatten tokens, transpose weights to
    # (in, out), cast the big streams to bf16, zero-pad ragged edges.
    x2 = x.reshape(N, H).astype(compute_dtype)
    if N_pad != N:
        x2 = jnp.pad(x2, ((0, N_pad - N), (0, 0)))
    wd = dense_w.T.astype(compute_dtype)                    # (H, H)
    wv = dec_w.T.astype(compute_dtype)                      # (H, V)
    bv = dec_b.astype(jnp.float32)
    if V_pad != V:
        wv = jnp.pad(wv, ((0, 0), (0, V_pad - V)))
        bv = jnp.pad(bv, (0, V_pad - V))
    bd2 = dense_b.reshape(1, H).astype(jnp.float32)
    g2 = ln_gamma.reshape(1, H).astype(jnp.float32)
    b2 = ln_beta.reshape(1, H).astype(jnp.float32)
    bv2 = bv.reshape(1, V_pad)

    grid = (N_pad // tm_eff, V_pad // tv_eff)

    isz = jnp.dtype(compute_dtype).itemsize
    osz = jnp.dtype(out_dtype).itemsize
    cost = pl.CostEstimate(
        flops=int(2 * N_pad * H * (H + V_pad)),
        transcendentals=int(N_pad * H),
        bytes_accessed=int(N_pad * H * isz            # x, once per token tile
                           + H * H * isz              # dense weight (resident)
                           + grid[0] * H * V_pad * isz  # decoder weight stream
                           + N_pad * V_pad * osz      # logits writeback
                           + 4 * (3 * H + V_pad)),    # biases / LN params
    )

    out = pl.pallas_call(
        _mlm_head_kernel,
        out_shape=jax.ShapeDtypeStruct((N_pad, V_pad), out_dtype),
        grid_spec=pltpu.PrefetchScalarGridSpec(
            num_scalar_prefetch=0,
            grid=grid,
            in_specs=[
                pl.BlockSpec((tm_eff, H), lambda i, j: (i, 0)),   # x tile
                pl.BlockSpec((H, H), lambda i, j: (0, 0)),        # dense weight
                pl.BlockSpec((1, H), lambda i, j: (0, 0)),        # dense bias
                pl.BlockSpec((1, H), lambda i, j: (0, 0)),        # ln gamma
                pl.BlockSpec((1, H), lambda i, j: (0, 0)),        # ln beta
                pl.BlockSpec((H, tv_eff), lambda i, j: (0, j)),   # decoder W tile
                pl.BlockSpec((1, tv_eff), lambda i, j: (0, j)),   # decoder b tile
            ],
            out_specs=pl.BlockSpec((tm_eff, tv_eff), lambda i, j: (i, j)),
            scratch_shapes=[pltpu.VMEM((tm_eff, H), compute_dtype)],
        ),
        compiler_params=pltpu.CompilerParams(
            dimension_semantics=("parallel", "arbitrary"),
            vmem_limit_bytes=48 * 1024 * 1024),
        cost_estimate=cost,
    )(x2, wd, bd2, g2, b2, wv, bv2)

    return out[:N, :V].reshape(B, S, V)


# ------------------ NSP head kernel: pooled @ W.T + b ------------------------

def _nsp_kernel(x_ref, w_ref, b_ref, o_ref):
    o_ref[...] = (jnp.dot(x_ref[...], w_ref[...],
                          preferred_element_type=jnp.float32)
                  + b_ref[...]).astype(o_ref.dtype)


def bert_nsp_head(pooled, w, b):
    """pooled: (B, H); w: (2, H) torch (out, in); b: (2,). Tiny — one shot."""
    B, H = pooled.shape
    K = w.shape[0]
    return pl.pallas_call(
        _nsp_kernel,
        out_shape=jax.ShapeDtypeStruct((B, K), jnp.float32),
    )(pooled.astype(jnp.float32), w.T.astype(jnp.float32),
      b.reshape(1, K).astype(jnp.float32))


# ------------------ BertPreTrainingHead ---------------------------------------

def bert_pretraining_head(seq_out, pooled_out,
                          dense_w, dense_b, ln_gamma, ln_beta,
                          dec_w, dec_b, nsp_w, nsp_b):
    # TODO(synk): the backbone `model` (input_ids/attention_mask/token_type_ids
    # -> (seq_out, pooled_out)) is an external module and is not translated;
    # this implements the MLM + NSP heads applied to its outputs.
    mlm_logits = bert_mlm_head(seq_out, dense_w, dense_b, ln_gamma, ln_beta,
                               dec_w, dec_b)
    nsp_logits = bert_nsp_head(pooled_out, nsp_w, nsp_b)
    return mlm_logits, nsp_logits


# ------------------ init + reference + test -----------------------------------

def _kaiming_uniform_fan_out(key, out_features, in_features):
    # torch kaiming_uniform_(mode='fan_out', nonlinearity='relu'):
    # bound = sqrt(2) * sqrt(3 / fan_out)
    bound = math.sqrt(2.0) * math.sqrt(3.0 / out_features)
    return jax.random.uniform(key, (out_features, in_features),
                              dtype=jnp.float32, minval=-bound, maxval=bound)


def _mlm_reference(x, dense_w, dense_b, g, b, dec_w, dec_b):
    h = x @ dense_w.T + dense_b
    h = 0.5 * h * (1.0 + jax.lax.erf(h / jnp.sqrt(2.0)))
    mu = jnp.mean(h, axis=-1, keepdims=True)
    var = jnp.mean((h - mu) ** 2, axis=-1, keepdims=True)
    h = (h - mu) / jnp.sqrt(var + LN_EPS) * g + b
    return h @ dec_w.T + dec_b


if __name__ == "__main__":
    B, S, H, V = 2, 8, 32, 512

    key = jax.random.PRNGKey(0)
    kx, kp, kd, kv, kn = jax.random.split(key, 5)

    # Backbone outputs (the external `model` is not part of these heads).
    seq_out = jax.random.normal(kx, (B, S, H), dtype=jnp.float32)
    pooled_out = jax.random.normal(kp, (B, H), dtype=jnp.float32)

    # Parameters matching BertMLMHead/BertNSPHead._init_weight.
    dense_w = _kaiming_uniform_fan_out(kd, H, H)      # (out=H, in=H)
    dense_b = jnp.zeros((H,), jnp.float32)
    ln_gamma = jnp.ones((H,), jnp.float32)
    ln_beta = jnp.zeros((H,), jnp.float32)
    dec_w = _kaiming_uniform_fan_out(kv, V, H)        # (out=V, in=H)
    dec_b = jnp.zeros((V,), jnp.float32)
    nsp_w = _kaiming_uniform_fan_out(kn, 2, H)        # (out=2, in=H)
    nsp_b = jnp.zeros((2,), jnp.float32)

    mlm_logits, nsp_logits = bert_pretraining_head(
        seq_out, pooled_out, dense_w, dense_b, ln_gamma, ln_beta,
        dec_w, dec_b, nsp_w, nsp_b)
    mlm_logits = jax.block_until_ready(mlm_logits)
    nsp_logits = jax.block_until_ready(nsp_logits)

    mlm_ref = _mlm_reference(seq_out, dense_w, dense_b, ln_gamma, ln_beta,
                             dec_w, dec_b)
    nsp_ref = pooled_out @ nsp_w.T + nsp_b

    assert mlm_logits.shape == (B, S, V)
    assert nsp_logits.shape == (B, 2)
    # bf16 weights/activations with f32 accumulation -> loose tolerance on MLM.
    assert jnp.allclose(mlm_logits.astype(jnp.float32), mlm_ref,
                        atol=3e-2, rtol=3e-2), "MLM mismatch vs reference"
    assert jnp.allclose(nsp_logits, nsp_ref,
                        atol=3e-2, rtol=3e-2), "NSP mismatch vs reference"

    print("KERNEL_OK")
</pallas_src>

<mosaic_0001>
module attributes {stable_mosaic.version = 11 : i64} {
  func.func @_mlm_head_kernel(%arg0: i32, %arg1: i32, %arg2: memref<16x32xbf16, #tpu.memory_space<vmem>>, %arg3: memref<32x32xbf16, #tpu.memory_space<vmem>>, %arg4: memref<1x32xf32, #tpu.memory_space<vmem>>, %arg5: memref<1x32xf32, #tpu.memory_space<vmem>>, %arg6: memref<1x32xf32, #tpu.memory_space<vmem>>, %arg7: memref<32x512xbf16, #tpu.memory_space<vmem>>, %arg8: memref<1x512xf32, #tpu.memory_space<vmem>>, %arg9: memref<16x512xbf16, #tpu.memory_space<vmem>>, %arg10: memref<16x32xbf16, #tpu.memory_space<vmem>>) attributes {dimension_semantics = [#tpu.dimension_semantics<parallel>, #tpu.dimension_semantics<arbitrary>], iteration_bounds = array<i64: 1, 1>, scalar_prefetch = 0 : i64, scratch_operands = 1 : i64, tpu.core_type = #tpu.core_type<tc>, window_params = [{transform_indices = @transform_0, window_bounds = array<i64: 16, 32>}, {pipeline_mode = #tpu.pipeline_mode<synchronous>, transform_indices = @transform_1, window_bounds = array<i64: 32, 32>}, {pipeline_mode = #tpu.pipeline_mode<synchronous>, transform_indices = @transform_2, window_bounds = array<i64: 1, 32>}, {pipeline_mode = #tpu.pipeline_mode<synchronous>, transform_indices = @transform_3, window_bounds = array<i64: 1, 32>}, {pipeline_mode = #tpu.pipeline_mode<synchronous>, transform_indices = @transform_4, window_bounds = array<i64: 1, 32>}, {transform_indices = @transform_5, window_bounds = array<i64: 32, 512>}, {transform_indices = @transform_6, window_bounds = array<i64: 1, 512>}, {transform_indices = @transform_7, window_bounds = array<i64: 16, 512>}]} {
    %c0_i32 = arith.constant 0 : i32
    %0 = arith.cmpi eq, %arg1, %c0_i32 : i32
    %1 = arith.extui %0 : i1 to i32
    %c0_i32_0 = arith.constant 0 : i32
    %2 = arith.cmpi ne, %1, %c0_i32_0 : i32
    scf.if %2 {
      %c0_8 = arith.constant 0 : index
      %c0_9 = arith.constant 0 : index
      %11 = vector.load %arg2[%c0_8, %c0_9] : memref<16x32xbf16, #tpu.memory_space<vmem>>, vector<16x32xbf16>
      %c0_10 = arith.constant 0 : index
      %c0_11 = arith.constant 0 : index
      %12 = vector.load %arg3[%c0_10, %c0_11] : memref<32x32xbf16, #tpu.memory_space<vmem>>, vector<32x32xbf16>
      %cst_12 = arith.constant dense<0.000000e+00> : vector<16x32xf32>
      %13 = tpu.matmul %11, %12, %cst_12 {dimension_numbers = #tpu.dot_dimension_numbers<[1], [0], [0], [1], [0, 0, 1, 1], [], []>} : vector<16x32xbf16>, vector<32x32xbf16>, vector<16x32xf32> -> vector<16x32xf32>
      %c0_13 = arith.constant 0 : index
      %c0_14 = arith.constant 0 : index
      %14 = vector.load %arg4[%c0_13, %c0_14] : memref<1x32xf32, #tpu.memory_space<vmem>>, vector<1x32xf32>
      %15 = vector.broadcast %14 : vector<1x32xf32> to vector<16x32xf32>
      %16 = arith.addf %13, %15 : vector<16x32xf32>
      %cst_15 = arith.constant 5.000000e-01 : f32
      %17 = vector.broadcast %cst_15 : f32 to vector<16x32xf32>
      %18 = arith.mulf %17, %16 : vector<16x32xf32>
      %cst_16 = arith.constant 0.707106769 : f32
      %19 = vector.broadcast %cst_16 : f32 to vector<16x32xf32>
      %20 = arith.mulf %16, %19 : vector<16x32xf32>
      %21 = math.erf %20 : vector<16x32xf32>
      %cst_17 = arith.constant 1.000000e+00 : f32
      %22 = vector.broadcast %cst_17 : f32 to vector<16x32xf32>
      %23 = arith.addf %22, %21 : vector<16x32xf32>
      %24 = arith.mulf %18, %23 : vector<16x32xf32>
      %cst_18 = arith.constant dense<0.000000e+00> : vector<16xf32>
      %25 = vector.multi_reduction <add>, %24, %cst_18 [1] : vector<16x32xf32> to vector<16xf32>
      %26 = vector.shape_cast %25 : vector<16xf32> to vector<16x1xf32>
      %cst_19 = arith.constant 3.200000e+01 : f32
      %27 = vector.broadcast %cst_19 : f32 to vector<16x1xf32>
      %28 = arith.divf %26, %27 : vector<16x1xf32>
      %29 = vector.broadcast %28 : vector<16x1xf32> to vector<16x32xf32>
      %30 = arith.subf %24, %29 : vector<16x32xf32>
      %31 = vector.broadcast %28 : vector<16x1xf32> to vector<16x32xf32>
      %32 = arith.subf %24, %31 : vector<16x32xf32>
      %33 = arith.mulf %30, %32 : vector<16x32xf32>
      %cst_20 = arith.constant dense<0.000000e+00> : vector<16xf32>
      %34 = vector.multi_reduction <add>, %33, %cst_20 [1] : vector<16x32xf32> to vector<16xf32>
      %35 = vector.shape_cast %34 : vector<16xf32> to vector<16x1xf32>
      %cst_21 = arith.constant 3.200000e+01 : f32
      %36 = vector.broadcast %cst_21 : f32 to vector<16x1xf32>
      %37 = arith.divf %35, %36 : vector<16x1xf32>
      %38 = vector.broadcast %28 : vector<16x1xf32> to vector<16x32xf32>
      %39 = arith.subf %24, %38 : vector<16x32xf32>
      %cst_22 = arith.constant 9.99999996E-13 : f32
      %40 = vector.broadcast %cst_22 : f32 to vector<16x1xf32>
      %41 = arith.addf %37, %40 : vector<16x1xf32>
      %42 = math.rsqrt %41 : vector<16x1xf32>
      %43 = vector.broadcast %42 : vector<16x1xf32> to vector<16x32xf32>
      %44 = arith.mulf %39, %43 : vector<16x32xf32>
      %c0_23 = arith.constant 0 : index
      %c0_24 = arith.constant 0 : index
      %45 = vector.load %arg5[%c0_23, %c0_24] : memref<1x32xf32, #tpu.memory_space<vmem>>, vector<1x32xf32>
      %46 = vector.broadcast %45 : vector<1x32xf32> to vector<16x32xf32>
      %47 = arith.mulf %44, %46 : vector<16x32xf32>
      %c0_25 = arith.constant 0 : index
      %c0_26 = arith.constant 0 : index
      %48 = vector.load %arg6[%c0_25, %c0_26] : memref<1x32xf32, #tpu.memory_space<vmem>>, vector<1x32xf32>
      %49 = vector.broadcast %48 : vector<1x32xf32> to vector<16x32xf32>
      %50 = arith.addf %47, %49 : vector<16x32xf32>
      %51 = arith.truncf %50 : vector<16x32xf32> to vector<16x32xbf16>
      %c0_27 = arith.constant 0 : index
      %c0_28 = arith.constant 0 : index
      %52 = vector.load %arg10[%c0_27, %c0_28] : memref<16x32xbf16, #tpu.memory_space<vmem>>, vector<16x32xbf16>
      tpu.vector_store %arg10[%c0_27, %c0_28], %51 {strides = array<i32>} : memref<16x32xbf16, #tpu.memory_space<vmem>>, vector<16x32xbf16>,
    } else {
    }
    %c0 = arith.constant 0 : index
    %c0_1 = arith.constant 0 : index
    %3 = vector.load %arg10[%c0, %c0_1] : memref<16x32xbf16, #tpu.memory_space<vmem>>, vector<16x32xbf16>
    %c0_2 = arith.constant 0 : index
    %c0_3 = arith.constant 0 : index
    %4 = vector.load %arg7[%c0_2, %c0_3] : memref<32x512xbf16, #tpu.memory_space<vmem>>, vector<32x512xbf16>
    %cst = arith.constant dense<0.000000e+00> : vector<16x512xf32>
    %5 = tpu.matmul %3, %4, %cst {dimension_numbers = #tpu.dot_dimension_numbers<[1], [0], [0], [1], [0, 0, 1, 1], [], []>} : vector<16x32xbf16>, vector<32x512xbf16>, vector<16x512xf32> -> vector<16x512xf32>
    %c0_4 = arith.constant 0 : index
    %c0_5 = arith.constant 0 : index
    %6 = vector.load %arg8[%c0_4, %c0_5] : memref<1x512xf32, #tpu.memory_space<vmem>>, vector<1x512xf32>
    %7 = vector.broadcast %6 : vector<1x512xf32> to vector<16x512xf32>
    %8 = arith.addf %5, %7 : vector<16x512xf32>
    %9 = arith.truncf %8 : vector<16x512xf32> to vector<16x512xbf16>
    %c0_6 = arith.constant 0 : index
    %c0_7 = arith.constant 0 : index
    %10 = vector.load %arg9[%c0_6, %c0_7] : memref<16x512xbf16, #tpu.memory_space<vmem>>, vector<16x512xbf16>
    tpu.vector_store %arg9[%c0_6, %c0_7], %9 {strides = array<i32>} : memref<16x512xbf16, #tpu.memory_space<vmem>>, vector<16x512xbf16>,
    return
  }
  func.func @transform_0(%arg0: i32, %arg1: i32) -> (i32, i32) {
    %c0_i32 = arith.constant 0 : i32
    %c0_i32_0 = arith.constant 0 : i32
    return %arg0, %c0_i32 : i32, i32
  }
  func.func @transform_1(%arg0: i32, %arg1: i32) -> (i32, i32) {
    %c0_i32 = arith.constant 0 : i32
    %c0_i32_0 = arith.constant 0 : i32
    %c0_i32_1 = arith.constant 0 : i32
    return %c0_i32, %c0_i32_0 : i32, i32
  }
  func.func @transform_2(%arg0: i32, %arg1: i32) -> (i32, i32) {
    %c0_i32 = arith.constant 0 : i32
    %c0_i32_0 = arith.constant 0 : i32
    %c0_i32_1 = arith.constant 0 : i32
    return %c0_i32, %c0_i32_0 : i32, i32
  }
  func.func @transform_3(%arg0: i32, %arg1: i32) -> (i32, i32) {
    %c0_i32 = arith.constant 0 : i32
    %c0_i32_0 = arith.constant 0 : i32
    %c0_i32_1 = arith.constant 0 : i32
    return %c0_i32, %c0_i32_0 : i32, i32
  }
  func.func @transform_4(%arg0: i32, %arg1: i32) -> (i32, i32) {
    %c0_i32 = arith.constant 0 : i32
    %c0_i32_0 = arith.constant 0 : i32
    %c0_i32_1 = arith.constant 0 : i32
    return %c0_i32, %c0_i32_0 : i32, i32
  }
  func.func @transform_5(%arg0: i32, %arg1: i32) -> (i32, i32) {
    %c0_i32 = arith.constant 0 : i32
    %c0_i32_0 = arith.constant 0 : i32
    return %c0_i32, %arg1 : i32, i32
  }
  func.func @transform_6(%arg0: i32, %arg1: i32) -> (i32, i32) {
    %c0_i32 = arith.constant 0 : i32
    %c0_i32_0 = arith.constant 0 : i32
    return %c0_i32, %arg1 : i32, i32
  }
  func.func @transform_7(%arg0: i32, %arg1: i32) -> (i32, i32) {
    %c0_i32 = arith.constant 0 : i32
    return %arg0, %arg1 : i32, i32
  }
}

</mosaic_0001>

<bundles_post_ra>
// kernel: tpu_custom_call.1
= control target key start
LH: loop header
LB: loop body
LE: loop exit
PB: predicated region body
PF: predicated region fallthrough
CT: control target
= control target key end

     0   :  { %12 = vsyncpa [#allocation4], 0  ;;  %s817_s0 = inlined_call_operand.hbm [shape: bf16[16,32], index: 0, kind: input, shape index: {}]   ;;  %s818_s1 = inlined_call_operand.hbm [shape: bf16[32,32], index: 1, kind: input, shape index: {}]   ;;  %s819_s2 = inlined_call_operand.vmem [shape: f32[1,32], index: 2, kind: input, shape index: {}]   ;;  %s820_s3 = inlined_call_operand.hbm [shape: f32[1,32], index: 3, kind: input, shape index: {}]   ;;  %s821_s4 = inlined_call_operand.hbm [shape: f32[1,32], index: 4, kind: input, shape index: {}]   ;;  %s822_s5 = inlined_call_operand.hbm [shape: bf16[32,512], index: 5, kind: input, shape index: {}]   ;;  %s823_s6 = inlined_call_operand.vmem [shape: f32[1,512], index: 6, kind: input, shape index: {}]   ;;  %s824_s7 = inlined_call_operand.hbm [shape: bf16[16,512], index: 7, kind: output, shape index: {}]  }
   0x1   :  { %13 = vsyncpa [#allocation7], 0 }
   0x2   :  { %14 = vsyncpa [#allocation10], 0 }
   0x3   :  { %15 = vsyncpa [#allocation5], 0  ;;  %s33_s26 = sshll.u32 %s818_s1, 4  ;;  %s704_s27 = smov [#allocation6]   ;;  %s34_s26 = int_to_ptr.hbm [resolvable:$true] %s33_s26 }
   0x4   :  { %s35_s28 = sshll.u32 %s704_s27, 4  ;;  %s60_s8 = sshll.u32 %s821_s4, 4  ;;  %s36_s28 = int_to_ptr.vmem [resolvable:$true] %s35_s28  ;;  %s61_s8 = int_to_ptr.hbm [resolvable:$true] %s60_s8 }
   0x5   :  { %s705_s9 = smov 64   ;;  %s706_s10 = smov 4  }
   0x6   :  { %41 = dma.hbm_to_vmem [thread:$0]  %s34_s26, 256, %s36_s28, [#allocation7], %s705_s9, %s705_s9, %s706_s10  }
   0x7   :  { %s707_s11 = smov [#allocation9]   ;;  %s20_s15 = sshll.u32 %s817_s0, 4  ;;  %s21_s15 = int_to_ptr.hbm [resolvable:$true] %s20_s15 }
   0x8   :  { %s62_s12 = sshll.u32 %s707_s11, 4  ;;  %s49_s17 = sshll.u32 %s820_s3, 4  ;;  %s63_s12 = int_to_ptr.vmem [resolvable:$true] %s62_s12  ;;  %s50_s17 = int_to_ptr.hbm [resolvable:$true] %s49_s17 }
   0x9   :  { %65 = dma.hbm_to_vmem [thread:$0]  %s61_s8, 16, %s63_s12, [#allocation10]  }
   0xa   :  { %s708_s18 = smov [#allocation3]   ;;  %s709_s4 = smov [#allocation8]  }
   0xb   :  { %s22_s19 = sshll.u32 %s708_s18, 4  ;;  %s51_s20 = sshll.u32 %s709_s4, 4  ;;  %s23_s19 = int_to_ptr.vmem [resolvable:$true] %s22_s19  ;;  %s52_s20 = int_to_ptr.vmem [resolvable:$true] %s51_s20 }
   0xc   :  { %28 = dma.hbm_to_vmem [thread:$0]  %s21_s15, 128, %s23_s19, [#allocation4], %s705_s9, %s705_s9, %s706_s10  }
   0xd   :  { %s70_s23 = sshll.u32 %s822_s5, 4  ;;  %s710_s0 = smov [#allocation11]   ;;  %s71_s23 = int_to_ptr.hbm [resolvable:$true] %s70_s23 }
   0xe   :  { %54 = dma.hbm_to_vmem [thread:$0]  %s50_s17, 16, %s52_s20, [#allocation7]  }
   0xf   :  { %s72_s24 = sshll.u32 %s710_s0, 4  ;;  %s711_s25 = smov 256   ;;  %s73_s24 = int_to_ptr.vmem [resolvable:$true] %s72_s24 }
  0x10   :  { %s712_s26 = smov 16  }
  0x11   :  { %78 = dma.hbm_to_vmem [thread:$0]  %s71_s23, 1024, %s73_s24, [#allocation10], %s711_s25, %s711_s25, %s712_s26  }
  0x12   :  { %696 = dma.done.wait [#allocation4], 128  }
  0x13   :  { %697 = vsyncadd [#allocation4], 4294967168 }
  0x14   :  { %698 = dma.done.wait [#allocation7], 272  }
  0x15   :  { %699 = vsyncadd [#allocation7], 4294967024 }
  0x16   :  { %700 = dma.done.wait [#allocation10], 1040  }
  0x17   :  { %701 = vsyncadd [#allocation10], 4294966256  ;;  %v518_v0 = vld [vmem:[#allocation6 + $0x8] sm:$0xff]  ;;  %v517_v1 = vld [vmem:[#allocation6] sm:$0xff]  ;;  %vm133_vm0 = vcmask 261120   ;;  %vm304_vm14 = vcmask 257024  }
  0x18   :  { %143 = vmatpush.bf16.msra.mxu0 %v518_v0  ;;  %v516_v2 = vld [vmem:[#allocation3] sm:$0xff]  ;;  %v539_v3 = vld [vmem:[%s819_s2] ss:$0 sm:$0xff]  ;;  %s446_s8 = sshll.u32 %s824_s7, 4  ;;  %s447_s8 = int_to_ptr.hbm [resolvable:$true] %s446_s8 }
  0x1c   :  { %144 = vmatpush.bf16.msra.mxu0 %v517_v1 }
  0x1f   :  { %473 = vmatmul.msk.bf16.vlgmr.msra.gmra.mxu0 %vm133_vm0, %v516_v2 }
  0x9c   :  { %v146_v4 = vpop.f32.mrf.mxu0 }
  0x9d   :  { %v777_v5 = vadd.f32 %v539_v3, %v146_v4 }
  0x9f   :  { %v153_v6 = vmul.f32 0.70710677, %v777_v5 }
  0xa1   :  { %v155_v7 = vmul.f32 %v153_v6, %v153_v6 }
  0xa3   :  { %v156_v8 = vmin.f32 %v155_v7, 16.0 }
  0xa4   :  { %v148_v9 = vpop.f32.mrf.mxu0 }
  0xa5   :  { %v157_v10 = vmul.f32 2.1237322e-06, %v156_v8  ;;  %v780_v11 = vadd.f32 %v539_v3, %v148_v9  ;;  %v168_v12 = vmul.f32 3.8918573e-05, %v156_v8 }
  0xa7   :  { %v158_v13 = vadd.f32 0.00028619796, %v157_v10  ;;  %v783_v14 = vmul.f32 0.70710677, %v780_v11  ;;  %v169_v15 = vadd.f32 0.001143296, %v168_v12 }
  0xa9   :  { %v159_v16 = vmul.f32 %v158_v13, %v156_v8  ;;  %v195_v17 = vmul.f32 %v783_v14, %v783_v14  ;;  %v170_v18 = vmul.f32 %v169_v15, %v156_v8  ;;  %v151_v13 = vmul.f32 0.5, %v777_v5 }
  0xab   :  { %v196_v19 = vmin.f32 %v195_v17, 16.0  ;;  %v171_v20 = vadd.f32 0.014752088, %v170_v18  ;;  %v160_v21 = vadd.f32 0.0036580483, %v159_v16 }
  0xad   :  { %v197_v22 = vmul.f32 2.1237322e-06, %v196_v19  ;;  %v208_v23 = vmul.f32 3.8918573e-05, %v196_v19  ;;  %v172_v24 = vmul.f32 %v171_v20, %v156_v8  ;;  %v161_v28 = vmul.f32 %v160_v21, %v156_v8 }
  0xaf   :  { %v198_v25 = vadd.f32 0.00028619796, %v197_v22  ;;  %v209_v26 = vadd.f32 0.001143296, %v208_v23  ;;  %v173_v27 = vadd.f32 0.112945676, %v172_v24 }
  0xb0   :  { %v162_v35 = vadd.f32 0.05243302, %v161_v28  ;;  %v152_v23 = vmul.f32 0.5, %v780_v11 }
  0xb1   :  { %v199_v29 = vmul.f32 %v198_v25, %v196_v19  ;;  %v210_v30 = vmul.f32 %v209_v26, %v196_v19  ;;  %v174_v31 = vmul.f32 %v173_v27, %v156_v8  ;;  %v713_v26 = vmov 32.0  }
  0xb2   :  { %v163_v41 = vmul.f32 %v162_v35, %v156_v8 }
  0xb3   :  { %v211_v32 = vadd.f32 0.014752088, %v210_v30  ;;  %v200_v33 = vadd.f32 0.0036580483, %v199_v29  ;;  %v175_v34 = vadd.f32 0.4994258, %v174_v31 }
  0xb4   :  { %v164_v45 = vadd.f32 0.18741608, %v163_v41 }
  0xb5   :  { %v212_v36 = vmul.f32 %v211_v32, %v196_v19  ;;  %v176_v37 = vmul.f32 %v175_v34, %v156_v8  ;;  %v201_v39 = vmul.f32 %v200_v33, %v196_v19 }
  0xb6   :  { %v165_v50 = vmul.f32 %v164_v45, %v156_v8  ;;  %v508_v45 = vld [vmem:[#allocation11 + $0x38] sm:$0xf0] }
  0xb7   :  { %v213_v38 = vadd.f32 0.112945676, %v212_v36  ;;  %v177_v40 = vadd.f32 1.0, %v176_v37  ;;  %v202_v44 = vadd.f32 0.05243302, %v201_v39 }
  0xb8   :  { %v166_v55 = vadd.f32 1.1283791, %v165_v50  ;;  %v500_v50 = vld [vmem:[#allocation11 + $0x30] sm:$0xf0] }
  0xb9   :  { %v214_v42 = vmul.f32 %v213_v38, %v196_v19  ;;  %542 = vrcp.f32 %v177_v40  ;;  %v203_v49 = vmul.f32 %v202_v44, %v196_v19  ;;  %v189_v54 = vand.u32 2147483648, %v177_v40  ;;  %v525_v44 = vld [vmem:[#allocation11 + $0x2c] sm:$0xf] }
  0xba   :  { %v187_v57 = vand.u32 2147483647, %v177_v40  ;;  %vm183_vm2 = vweird.f32 %v177_v40  ;;  %v167_v63 = vmul.f32 %v166_v55, %v153_v6  ;;  %v527_v55 = vld [vmem:[#allocation11 + $0x34] sm:$0xf0] }
  0xbb   :  { %v215_v43 = vadd.f32 0.4994258, %v214_v42  ;;  %v204_v53 = vadd.f32 0.18741608, %v203_v49  ;;  %v190_v61 = vor.u32 1.1754944e-38, %v189_v54 }
  0xbc   :  { %vm188_vm4 = vcmp.eq.f32.partialorder %v187_v57, 8.507059e+37  ;;  %v524_v49 = vld [vmem:[#allocation11 + $0x24] sm:$0xf]  ;;  %v506_v54 = vld [vmem:[#allocation11 + $0x28] sm:$0xf] }
  0xbd   :  { %v216_v46 = vmul.f32 %v215_v43, %v196_v19  ;;  %v205_v60 = vmul.f32 %v204_v53, %v196_v19  ;;  %v503_v53 = vor.u32 %v524_v49, %v500_v50 }
  0xbf   :  { %v217_v47 = vadd.f32 1.0, %v216_v46  ;;  %v543_v48 = vpop.eup %542  ;;  %v206_v7 = vadd.f32 1.1283791, %v205_v60  ;;  %v498_v46 = vld [vmem:[#allocation11 + $0x20] sm:$0xf]  ;;  %396 = vmatpush.bf16.msra.mxu2 %v503_v53 }
  0xc0   :  { %v179_v51 = vmul.f32 %v543_v48, %v177_v40  ;;  %vm184_vm1 = vweird.f32 %v543_v48  ;;  %v520_v60 = vld [vmem:[#allocation11 + $0x4] sm:$0xf] }
  0xc1   :  { %544 = vrcp.f32 %v217_v47  ;;  %vm185_vm3 = vmor %vm183_vm2, %vm184_vm1  ;;  %v229_v4 = vand.u32 2147483648, %v217_v47  ;;  %v227_v9 = vand.u32 2147483647, %v217_v47  ;;  %vm223_vm6 = vweird.f32 %v217_v47 }
  0xc2   :  { %v180_v52 = vsub.f32 1.0, %v179_v51  ;;  %v207_v6 = vmul.f32 %v206_v7, %v783_v14  ;;  %546 = vrcp.f32 %v713_v26 }
  0xc3   :  { %v230_v16 = vor.u32 1.1754944e-38, %v229_v4  ;;  %vm228_vm8 = vcmp.eq.f32.partialorder %v227_v9, 8.507059e+37 }
  0xc4   :  { %v181_v56 = vmul.f32 %v543_v48, %v180_v52 }
  0xc6   :  { %v182_v59 = vadd.f32 %v543_v48, %v181_v56  ;;  %v482_v56 = vld [vmem:[#allocation11] sm:$0xf] }
  0xc7   :  { %v545_v58 = vpop.eup %544 }
  0xc8   :  { %v219_v62 = vmul.f32 %v545_v58, %v217_v47  ;;  %v186_v0 = vsel %vm185_vm3, %v543_v48, %v182_v59  ;;  %vm224_vm5 = vweird.f32 %v545_v58  ;;  %v547_v27 = vpop.eup %546  ;;  %v511_v47 = vor.u32 %v525_v44, %v508_v45  ;;  %v526_v48 = vld [vmem:[#allocation11 + $0x2c] sm:$0xf0] }
  0xc9   :  { %v191_v1 = vsel %vm188_vm4, %v190_v61, %v186_v0  ;;  %vm225_vm7 = vmor %vm223_vm6, %vm224_vm5  ;;  %v246_v14 = vmul.f32 32.0, %v547_v27  ;;  %vm250_vm9 = vweird.f32 %v547_v27  ;;  %v499_v52 = vor.u32 %v526_v48, %v498_v46  ;;  %v522_v59 = vld [vmem:[#allocation11 + $0xc] sm:$0xf0]  ;;  %v484_v61 = vld [vmem:[#allocation11 + $0x10] sm:$0xf0] }
  0xca   :  { %v220_v2 = vsub.f32 1.0, %v219_v62  ;;  %v192_v3 = vmul.f32 %v191_v1, %v167_v63  ;;  %424 = vmatpush.bf16.msrb.mxu0 %v511_v47  ;;  %v483_v62 = vor.u32 %v522_v59, %v482_v56  ;;  %v487_v63 = vor.u32 %v520_v60, %v484_v61  ;;  %v490_v0 = vld [vmem:[#allocation11 + $0x8] sm:$0xf]  ;;  %v523_v1 = vld [vmem:[#allocation11 + $0x14] sm:$0xf0] }
  0xcb   :  { %v247_v28 = vsub.f32 1.0, %v246_v14  ;;  %382 = vmatpush.bf16.msra.mxu1 %v499_v52  ;;  %v491_v7 = vor.u32 %v523_v1, %v490_v0 }
  0xcc   :  { %v221_v8 = vmul.f32 %v545_v58, %v220_v2  ;;  %v474_v10 = vclamps-f32 %v192_v3, 1.0  ;;  %v521_v2 = vld [vmem:[#allocation11 + $0xc] sm:$0xf]  ;;  %397 = vmatpush.bf16.msra.mxu2 %v487_v63 }
  0xcd   :  { %v248_v29 = vmul.f32 %v547_v27, %v247_v28 }
  0xce   :  { %v222_v12 = vadd.f32 %v545_v58, %v221_v8  ;;  %v235_v15 = vadd.f32 1.0, %v474_v10  ;;  %v492_v8 = vld [vmem:[#allocation11 + $0x18] sm:$0xf0] }
  0xcf   :  { %v249_v30 = vadd.f32 %v547_v27, %v248_v29  ;;  %v495_v10 = vor.u32 %v521_v2, %v492_v8  ;;  %383 = vmatpush.bf16.msra.mxu1 %v483_v62 }
  0xd0   :  { %v226_v17 = vsel %vm225_vm7, %v545_v58, %v222_v12  ;;  %v237_v18 = vmul.f32 %v235_v15, %v151_v13  ;;  %v507_v58 = vor.u32 %v527_v55, %v506_v54 }
  0xd1   :  { %v231_v19 = vsel %vm228_vm8, %v230_v16, %v226_v17  ;;  %v251_v31 = vsel %vm250_vm9, %v547_v27, %v249_v30  ;;  %425 = vmatpush.bf16.msrb.mxu0 %v495_v10 }
  0xd2   :  { %v232_v20 = vmul.f32 %v231_v19, %v207_v6  ;;  %v239_v21 = vsel %vm133_vm0, %v237_v18, 0.0  ;;  %410 = vmatpush.bf16.msra.mxu3 %v507_v58 }
  0xd3   :  { %240 = vadd.xlane.f32.xlu0 %v239_v21  ;;  %v541_v21 = vld [vmem:[#allocation9] ss:$0 sm:$0xff] }
  0xd4   :  { %v475_v22 = vclamps-f32 %v232_v20, 1.0 }
  0xd6   :  { %v236_v24 = vadd.f32 1.0, %v475_v22  ;;  %411 = vmatpush.bf16.msra.mxu3 %v491_v7 }
  0xd8   :  { %v238_v25 = vmul.f32 %v236_v24, %v152_v23 }
  0xda   :  { %v242_v5 = vsel %vm133_vm0, %v238_v25, 0.0 }
  0xdb   :  { %243 = vadd.xlane.f32.xlu0 %v242_v5 }
 0x146   :  { %v241_v32 = vpop.xlane.xlu0 %240 }
 0x147   :  { %v252_v33 = vmul.f32 %v251_v31, %v241_v32 }
 0x149   :  { %v792_v34 = vsub.f32 %v237_v18, %v252_v33  ;;  %v540_v18 = vld [vmem:[#allocation8] ss:$0 sm:$0xff] }
 0x14a   :  { %v317_v33 = vld [vmem:[%s823_s6] sm:$0xf]  ;;  %s714_s6 = smov [#allocation12]  }
 0x14b   :  { %v256_v11 = vmul.f32 %v792_v34, %v792_v34  ;;  %s444_s28 = sshll.u32 %s714_s6, 4  ;;  %s445_s28 = int_to_ptr.vmem [resolvable:$true] %s444_s28 }
 0x14d   :  { %v258_v35 = vsel %vm133_vm0, %v256_v11, 0.0  ;;  %v319_v11 = vperm.slane %v317_v33, 0 }
 0x14e   :  { %259 = vadd.xlane.f32.xlu1 %v258_v35  ;;  %v244_v36 = vpop.xlane.xlu0 %243 }
 0x14f   :  { %v253_v37 = vmul.f32 %v251_v31, %v244_v36  ;;  %v320_v36 = vperm.slane %v317_v33, 1 }
 0x151   :  { %v797_v38 = vsub.f32 %v238_v25, %v253_v37  ;;  %v322_v37 = vperm.slane %v317_v33, 3 }
 0x153   :  { %v257_v39 = vmul.f32 %v797_v38, %v797_v38 }
 0x155   :  { %v261_v40 = vsel %vm133_vm0, %v257_v39, 0.0 }
 0x156   :  { %262 = vadd.xlane.f32.xlu1 %v261_v40 }
 0x1c1   :  { %v260_v41 = vpop.xlane.xlu1 %259 }
 0x1c2   :  { %v264_v42 = vmul.f32 %v260_v41, %v251_v31 }
 0x1c4   :  { %v266_v43 = vadd.f32 1e-12, %v264_v42 }
 0x1c6   :  { %548 = vrsqrt.f32 %v266_v43  ;;  %vm274_vm11 = vweird.f32 %v266_v43 }
 0x1c9   :  { %v263_v51 = vpop.xlane.xlu1 %262 }
 0x1ca   :  { %v265_v57 = vmul.f32 %v263_v51, %v251_v31 }
 0x1cc   :  { %v549_v3 = vpop.eup %548  ;;  %v267_v4 = vadd.f32 1e-12, %v265_v57 }
 0x1cd   :  { %v269_v9 = vmul.f32 %v549_v3, %v266_v43  ;;  %vm275_vm10 = vweird.f32 %v549_v3 }
 0x1ce   :  { %550 = vrsqrt.f32 %v267_v4  ;;  %vm276_vm12 = vmor %vm274_vm11, %vm275_vm10  ;;  %vm284_vm15 = vweird.f32 %v267_v4 }
 0x1cf   :  { %v270_v12 = vmul.f32 %v549_v3, %v269_v9 }
 0x1d1   :  { %v271_v13 = vmul.f32 0.5, %v270_v12 }
 0x1d3   :  { %v272_v15 = vsub.f32 1.5, %v271_v13 }
 0x1d4   :  { %v551_v16 = vpop.eup %550 }
 0x1d5   :  { %v273_v6 = vmul.f32 %v549_v3, %v272_v15  ;;  %v279_v17 = vmul.f32 %v551_v16, %v267_v4  ;;  %vm285_vm13 = vweird.f32 %v551_v16 }
 0x1d6   :  { %vm286_vm1 = vmor %vm284_vm15, %vm285_vm13 }
 0x1d7   :  { %v277_v19 = vsel %vm276_vm12, %v549_v3, %v273_v6  ;;  %v280_v20 = vmul.f32 %v551_v16, %v279_v17 }
 0x1d8   :  { %v288_v22 = vmul.f32 %v277_v19, %v792_v34 }
 0x1d9   :  { %v281_v23 = vmul.f32 0.5, %v280_v20 }
 0x1da   :  { %v294_v24 = vmul.f32 %v540_v18, %v288_v22 }
 0x1db   :  { %v282_v25 = vsub.f32 1.5, %v281_v23 }
 0x1dc   :  { %v300_v5 = vadd.f32 %v541_v21, %v294_v24 }
 0x1dd   :  { %v283_v26 = vmul.f32 %v551_v16, %v282_v25 }
 0x1de   :  { %v302_v27 = vpack.c.bf16 %v300_v5, %v300_v5 }
 0x1df   :  { %v287_v14 = vsel %vm286_vm1, %v551_v16, %v283_v26 }
 0x1e0   :  { %305 = vst.msk [vmem:[#allocation2] sm:$0xf] %vm304_vm14, %v302_v27  ;;  %v289_v28 = vmul.f32 %v287_v14, %v797_v38  ;;  %v321_v38 = vperm.slane %v317_v33, 2 }
 0x1e2   :  { %v295_v29 = vmul.f32 %v540_v18, %v289_v28 }
 0x1e4   :  { %v301_v30 = vadd.f32 %v541_v21, %v295_v29 }
 0x1e6   :  { %v303_v31 = vpack.c.bf16 %v301_v30, %v301_v30 }
 0x1e8   :  { %306 = vst.msk [vmem:[#allocation2 + $0x4] sm:$0xf] %vm304_vm14, %v303_v31 }
 0x1ef   :  { %v519_v32 = vld [vmem:[#allocation2] sm:$0xff] }
 0x1f0   :  { %512 = vmatmul.msk.bf16.vlgmr.msra.gmra.mxu1 %vm133_vm0, %v519_v32  ;;  %513 = vmatmul.msk.bf16.vlgmr.msra.gmra.mxu2 %vm133_vm0, %v519_v32 }
 0x1f1   :  { %514 = vmatmul.msk.bf16.vlgmr.msra.gmra.mxu3 %vm133_vm0, %v519_v32  ;;  %515 = vmatmul.msk.bf16.vlgmr.msrb.gmra.mxu0 %vm133_vm0, %v519_v32 }
 0x26d   :  { %v385_v34 = vpop.f32.mrf.mxu1 }
 0x26e   :  { %v427_v35 = vpop.f32.mrf.mxu0  ;;  %v386_v40 = vadd.f32 %v385_v34, %v319_v11 }
 0x26f   :  { %v428_v43 = vadd.f32 %v427_v35, %v322_v37 }
 0x273   :  { %v399_v39 = vpop.f32.mrf.mxu2 }
 0x274   :  { %v400_v41 = vadd.f32 %v399_v39, %v320_v36  ;;  %v413_v42 = vpop.f32.mrf.mxu3 }
 0x275   :  { %v414_v44 = vadd.f32 %v413_v42, %v321_v38  ;;  %v387_v47 = vpop.f32.mrf.mxu1 }
 0x276   :  { %v432_v45 = vpack.c.bf16 %v400_v41, %v386_v40  ;;  %v429_v48 = vpop.f32.mrf.mxu0  ;;  %v388_v50 = vadd.f32 %v387_v47, %v319_v11 }
 0x277   :  { %v433_v46 = vpack.c.bf16 %v428_v43, %v414_v44  ;;  %v430_v53 = vadd.f32 %v429_v48, %v322_v37 }
 0x278   :  { %436 = vst [vmem:[#allocation12] sm:$0xff] %v432_v45 }
 0x279   :  { %437 = vst [vmem:[#allocation12 + $0x8] sm:$0xff] %v433_v46 }
 0x27b   :  { %v401_v49 = vpop.f32.mrf.mxu2 }
 0x27c   :  { %v402_v51 = vadd.f32 %v401_v49, %v320_v36  ;;  %v415_v52 = vpop.f32.mrf.mxu3 }
 0x27d   :  { %v416_v54 = vadd.f32 %v415_v52, %v321_v38 }
 0x27e   :  { %v434_v55 = vpack.c.bf16 %v402_v51, %v388_v50 }
 0x27f   :  { %v435_v56 = vpack.c.bf16 %v430_v53, %v416_v54 }
 0x280   :  { %438 = vst [vmem:[#allocation12 + $0x10] sm:$0xff] %v434_v55 }
 0x281   :  { %439 = vst [vmem:[#allocation12 + $0x18] sm:$0xff] %v435_v56 }
 0x282   :  { %452 = dma.vmem_to_hbm [thread:$0]  %s445_s28, 512, %s447_s8, [#allocation5], %s711_s25, %s711_s25, %s712_s26  }
 0x283   :  { %702 = dma.done.wait [#allocation5], 512  }
 0x284   :  { %703 = vsyncadd [#allocation5], 4294966784 }
 0x285   :  { %457 = vsyncpa [#allocation4], 1 }
 0x286   :  { %458 = vsyncpa [#allocation7], 1 }
 0x287   :  { %459 = vsyncpa [#allocation10], 1 }
 0x288   :  { %460 = vsyncpa [#allocation5], 1 }

</bundles_post_ra>
